<compile_context>
chip_gen: v7x
topology: tpu7x:2x2x1
jax: 0.10.0
libtpu: 0.0.40
codegen_flags: <defaults>
</compile_context>

<pallas_src>
import functools
import math

import jax
import jax.numpy as jnp
from jax.experimental import pallas as pl
from jax.experimental.pallas import tpu as pltpu

# ----------------------------- Pallas kernels ------------------------------
# Matmul kernels: A/B operands are bf16, accumulation + epilogue in f32,
# outputs written back as bf16.

# --- single-K-pass kernels (K fits one MXU pass; no scratch, no pl.when) ---


def _mm1_kernel(a_ref, b_ref, bias_ref, o_ref):
    acc = jnp.dot(a_ref[...], b_ref[...], preferred_element_type=jnp.float32)
    o_ref[...] = (acc + bias_ref[...]).astype(o_ref.dtype)


def _mm1_relu_kernel(a_ref, b_ref, bias_ref, o_ref):
    acc = jnp.dot(a_ref[...], b_ref[...], preferred_element_type=jnp.float32)
    o_ref[...] = jnp.maximum(acc + bias_ref[...], 0.0).astype(o_ref.dtype)


def _mm1_res_relu_kernel(a_ref, b_ref, bias_ref, res_ref, o_ref):
    """conv + bias + residual add + ReLU, fused (bottleneck shortcut)."""
    acc = jnp.dot(a_ref[...], b_ref[...], preferred_element_type=jnp.float32)
    acc = acc + bias_ref[...] + res_ref[...].astype(jnp.float32)
    o_ref[...] = jnp.maximum(acc, 0.0).astype(o_ref.dtype)


# --- multi-K-pass kernels (K split over an 'arbitrary' grid axis) ---


def _mm_kernel(a_ref, b_ref, bias_ref, o_ref, acc_ref):
    @pl.when(pl.program_id(2) == 0)
    def _():
        acc_ref[...] = jnp.zeros_like(acc_ref)

    acc_ref[...] += jnp.dot(a_ref[...], b_ref[...],
                            preferred_element_type=jnp.float32)

    @pl.when(pl.program_id(2) == pl.num_programs(2) - 1)
    def _():
        o_ref[...] = (acc_ref[...] + bias_ref[...]).astype(o_ref.dtype)


def _mm_relu_kernel(a_ref, b_ref, bias_ref, o_ref, acc_ref):
    @pl.when(pl.program_id(2) == 0)
    def _():
        acc_ref[...] = jnp.zeros_like(acc_ref)

    acc_ref[...] += jnp.dot(a_ref[...], b_ref[...],
                            preferred_element_type=jnp.float32)

    @pl.when(pl.program_id(2) == pl.num_programs(2) - 1)
    def _():
        o_ref[...] = jnp.maximum(acc_ref[...] + bias_ref[...],
                                 0.0).astype(o_ref.dtype)


def _mm_res_relu_kernel(a_ref, b_ref, bias_ref, res_ref, o_ref, acc_ref):
    @pl.when(pl.program_id(2) == 0)
    def _():
        acc_ref[...] = jnp.zeros_like(acc_ref)

    acc_ref[...] += jnp.dot(a_ref[...], b_ref[...],
                            preferred_element_type=jnp.float32)

    @pl.when(pl.program_id(2) == pl.num_programs(2) - 1)
    def _():
        acc = acc_ref[...] + bias_ref[...] + res_ref[...].astype(jnp.float32)
        o_ref[...] = jnp.maximum(acc, 0.0).astype(o_ref.dtype)


def _l2norm_kernel(x_ref, w_ref, o_ref):
    x = x_ref[...].astype(jnp.float32)           # bf16 in, f32 accumulation
    ssum = jnp.sum(x * x, axis=-1, keepdims=True)
    inv = jax.lax.rsqrt(ssum + 1e-12)            # EUP rsqrt (free slot)
    o_ref[...] = (x * inv * w_ref[...]).astype(o_ref.dtype)


# ------------------------------ matmul wrapper ------------------------------


def _rup(n, m):
    return ((n + m - 1) // m) * m


def _cdiv(a, b):
    return -(-a // b)


_MAX_SINGLE_K = 4608  # largest K handled as one MXU pass (~5 MiB VMEM blocks)


def _vmem_limit_bytes():
    # v6e has 128 MiB VMEM/TC -> allow deeper buffering; keep 32 MiB on
    # v7x (64 MiB/TC) and v5e so double-buffered big tiles never spill.
    try:
        cap = pltpu.get_tpu_info().vmem_capacity_bytes
    except Exception:  # pragma: no cover - older jax / query unavailable
        cap = 0
    return 64 * 1024 * 1024 if cap >= 100 * 1024 * 1024 else 32 * 1024 * 1024


_VMEM_LIMIT = _vmem_limit_bytes()


def _pick_tiles(m, n, k):
    # K: prefer a single pass (specialized kernel); otherwise an exact divisor
    # of K; otherwise pad K up.
    if k <= _MAX_SINGLE_K:
        tk, kp = k, k
    elif k % 2048 == 0:
        tk, kp = 2048, k
    elif k % 1024 == 0:
        tk, kp = 1024, k
    elif k % 512 == 0:
        tk, kp = 512, k
    else:
        tk, kp = 512, _rup(k, 512)
    # M: 256-row tiles for big M; a single block for mid-sized M so B tiles
    # are streamed only once per N block (e.g. dilated conv, M=162, K=18432).
    tm = 256 if m >= 512 else min(256, _rup(m, 16))
    # N: take the full width when it fits one 256-wide tile, else 256 tiles.
    tn = n if n <= 256 else 256
    # v7x megacore: make sure there are >= 2 parallel (M, N) blocks so the
    # second TensorCore is not idle on small extras / head layers.
    if _cdiv(m, tm) * _cdiv(n, tn) < 2:
        if tn > 128:
            tn = 128                      # stays lane-dense (>=128 lanes)
        elif m >= 32:
            tm = max(16, _rup(_cdiv(m, 2), 16))
    return tm, tn, tk, kp


def pallas_matmul(a, b, bias, relu, residual=None):
    """(M,K)@(K,N) + bias[N] (+ residual, + ReLU). bf16 in/out, f32 acc."""
    m, k = a.shape
    _, n = b.shape
    tm, tn, tk, kp = _pick_tiles(m, n, k)
    a = a.astype(jnp.bfloat16)
    b = b.astype(jnp.bfloat16)
    if kp != k:  # zero-pad K only (required for correct accumulation)
        a = jnp.pad(a, ((0, 0), (0, kp - k)))
        b = jnp.pad(b, ((0, kp - k), (0, 0)))
    bias2 = bias.reshape(1, n).astype(jnp.float32)
    single = (kp == tk)

    if single:
        grid = (pl.cdiv(m, tm), pl.cdiv(n, tn))
        in_specs = [
            pl.BlockSpec((tm, tk), lambda i, j: (i, 0)),
            pl.BlockSpec((tk, tn), lambda i, j: (0, j)),
            pl.BlockSpec((1, tn), lambda i, j: (0, j)),
        ]
        out_spec = pl.BlockSpec((tm, tn), lambda i, j: (i, j))
        scratch = []
        semantics = ("parallel", "parallel")
        if residual is None:
            kernel = _mm1_relu_kernel if relu else _mm1_kernel
            operands = (a, b, bias2)
        else:
            kernel = _mm1_res_relu_kernel
            in_specs.append(pl.BlockSpec((tm, tn), lambda i, j: (i, j)))
            operands = (a, b, bias2,
                        residual.reshape(m, n).astype(jnp.bfloat16))
    else:
        grid = (pl.cdiv(m, tm), pl.cdiv(n, tn), kp // tk)
        in_specs = [
            pl.BlockSpec((tm, tk), lambda i, j, kk: (i, kk)),
            pl.BlockSpec((tk, tn), lambda i, j, kk: (kk, j)),
            pl.BlockSpec((1, tn), lambda i, j, kk: (0, j)),
        ]
        out_spec = pl.BlockSpec((tm, tn), lambda i, j, kk: (i, j))
        scratch = [pltpu.VMEM((tm, tn), jnp.float32)]
        semantics = ("parallel", "parallel", "arbitrary")
        if residual is None:
            kernel = _mm_relu_kernel if relu else _mm_kernel
            operands = (a, b, bias2)
        else:
            kernel = _mm_res_relu_kernel
            in_specs.append(pl.BlockSpec((tm, tn), lambda i, j, kk: (i, j)))
            operands = (a, b, bias2,
                        residual.reshape(m, n).astype(jnp.bfloat16))

    return pl.pallas_call(
        kernel,
        out_shape=jax.ShapeDtypeStruct((m, n), jnp.bfloat16),
        grid_spec=pltpu.PrefetchScalarGridSpec(
            num_scalar_prefetch=0,
            grid=grid,
            in_specs=in_specs,
            out_specs=out_spec,
            scratch_shapes=scratch,
        ),
        compiler_params=pltpu.CompilerParams(
            dimension_semantics=semantics,
            vmem_limit_bytes=_VMEM_LIMIT),
    )(*operands)


# ----------------------------- layer wrappers -------------------------------


@functools.partial(jax.jit,
                   static_argnames=("stride", "padding", "dilation", "relu"))
def conv2d(x, w, b, stride=1, padding=0, dilation=1, relu=False,
           residual=None):
    """NHWC conv via im2col (bf16, XLA glue) + Pallas matmul (MXU hot path).

    If `residual` (same shape as the conv output) is given, the epilogue
    computes relu(conv(x) + bias + residual) fused inside the matmul kernel.
    """
    n, h, wd, cin = x.shape
    kh, kw, _, cout = w.shape
    x = x.astype(jnp.bfloat16)  # halves im2col HBM traffic; f32 accumulation
    if kh == 1 and kw == 1 and stride == 1 and padding == 0:
        oh, ow = h, wd
        a = x.reshape(n * oh * ow, cin)  # 1x1 conv: no im2col copy needed
    else:
        # TODO(synk): gather the KHxKW taps inside the kernel via manual halo
        # DMA instead of materializing the im2col matrix in HBM.
        xp = jnp.pad(x, ((0, 0), (padding, padding), (padding, padding),
                         (0, 0)))
        oh = (h + 2 * padding - dilation * (kh - 1) - 1) // stride + 1
        ow = (wd + 2 * padding - dilation * (kw - 1) - 1) // stride + 1
        cols = []
        for ih in range(kh):
            for iw in range(kw):
                h0 = ih * dilation
                w0 = iw * dilation
                cols.append(xp[:, h0:h0 + (oh - 1) * stride + 1:stride,
                               w0:w0 + (ow - 1) * stride + 1:stride, :])
        a = jnp.concatenate(cols, axis=-1).reshape(n * oh * ow, kh * kw * cin)
    out = pallas_matmul(a, w.reshape(kh * kw * cin, cout), b, relu, residual)
    return out.reshape(n, oh, ow, cout)


@functools.partial(jax.jit, static_argnames=("ksize", "stride", "padding"))
def maxpool2d(x, ksize, stride, padding):
    """Max pool as a fused XLA tap reduction (no HBM tap stack).

    A Pallas kernel here would force the KxK tap stack to be materialized in
    HBM (strided/offset windows are not expressible as BlockSpecs); the fused
    slice+max tree reads the padded activation once instead.
    """
    n, h, wd, c = x.shape
    xp = jnp.pad(x, ((0, 0), (padding, padding), (padding, padding), (0, 0)),
                 constant_values=-jnp.inf)
    oh = (h + 2 * padding - ksize) // stride + 1
    ow = (wd + 2 * padding - ksize) // stride + 1
    out = None
    for ih in range(ksize):
        for iw in range(ksize):
            tap = xp[:, ih:ih + (oh - 1) * stride + 1:stride,
                     iw:iw + (ow - 1) * stride + 1:stride, :]
            out = tap if out is None else jnp.maximum(out, tap)
    return out


@jax.jit
def l2norm(x, weight):
    n, h, wd, c = x.shape
    m = n * h * wd
    tm = min(1024, _rup(m, 8))
    out = pl.pallas_call(
        _l2norm_kernel,
        out_shape=jax.ShapeDtypeStruct((m, c), jnp.bfloat16),
        grid=(pl.cdiv(m, tm),),
        in_specs=[pl.BlockSpec((tm, c), lambda i: (i, 0)),
                  pl.BlockSpec((1, c), lambda i: (0, 0))],
        out_specs=pl.BlockSpec((tm, c), lambda i: (i, 0)),
    )(x.reshape(m, c).astype(jnp.bfloat16),
      weight.reshape(1, c).astype(jnp.float32))
    return out.reshape(n, h, wd, c)


# ------------------------- deterministic parameters -------------------------


class _Keys:
    def __init__(self, seed):
        self._key = jax.random.PRNGKey(seed)

    def next(self):
        self._key, sub = jax.random.split(self._key)
        return sub


def conv_params(keys, k, cin, cout):
    fan_in = k * k * cin
    w = jax.random.normal(keys.next(), (k, k, cin, cout),
                          jnp.float32) * math.sqrt(2.0 / fan_in)
    b = jax.random.normal(keys.next(), (cout,), jnp.float32) * 0.01
    return {"w": w, "b": b}


def conv_bn_params(keys, k, cin, cout):
    # conv (bias=False) followed by eval-mode BatchNorm folded in.
    fan_in = k * k * cin
    w = jax.random.normal(keys.next(), (k, k, cin, cout),
                          jnp.float32) * math.sqrt(2.0 / fan_in)
    gamma = jnp.ones((cout,), jnp.float32)
    beta = jnp.zeros((cout,), jnp.float32)
    mean = jnp.zeros((cout,), jnp.float32)
    var = jnp.ones((cout,), jnp.float32)
    scale = gamma / jnp.sqrt(var + 1e-5)
    return {"w": w * scale, "b": beta - mean * scale}


def build_params(num_classes, bboxes, seed=0):
    keys = _Keys(seed)
    p = {}
    p["conv1"] = conv_bn_params(keys, 7, 3, 64)
    layer_cfg = [(64, 3, 1), (128, 4, 2), (256, 6, 2), (512, 3, 2)]
    inplanes = 64
    layers = []
    for planes, blocks, stride in layer_cfg:
        blocks_p = []
        for bi in range(blocks):
            s = stride if bi == 0 else 1
            bp = {
                "conv1": conv_bn_params(keys, 1, inplanes, planes),
                "conv2": conv_bn_params(keys, 3, planes, planes),
                "conv3": conv_bn_params(keys, 1, planes, planes * 4),
                "stride": s,
            }
            if bi == 0:
                bp["down"] = conv_bn_params(keys, 1, inplanes, planes * 4)
            blocks_p.append(bp)
            inplanes = planes * 4
        layers.append(blocks_p)
    p["layers"] = layers
    p["conv_dil"] = conv_params(keys, 3, 2048, 1024)   # k3, pad 6, dilation 6
    p["conv_1x1"] = conv_params(keys, 1, 1024, 1024)
    extra_cfg = [(1, 1, 0, 1024, 256), (3, 1, 1, 256, 512),
                 (1, 1, 0, 512, 128), (3, 2, 1, 128, 256),
                 (1, 1, 0, 256, 128), (3, 1, 0, 128, 256),
                 (1, 1, 0, 256, 128), (3, 1, 0, 128, 256)]
    extras = []
    for (k, s, pad, cin, cout) in extra_cfg:
        e = conv_params(keys, k, cin, cout)
        e["stride"], e["padding"] = s, pad
        extras.append(e)
    p["extras"] = extras
    head_in = [512, 1024, 512, 256, 256, 256]
    p["reg_heads"] = [conv_params(keys, 3, cin, b * 4)
                      for cin, b in zip(head_in, bboxes)]
    p["cls_heads"] = [conv_params(keys, 3, cin, b * num_classes)
                      for cin, b in zip(head_in, bboxes)]
    p["l2norm_w"] = jnp.full((512,), 20.0, jnp.float32)
    return p


# ------------------------------ forward pass --------------------------------


def bottleneck(x, bp):
    out = conv2d(x, bp["conv1"]["w"], bp["conv1"]["b"],
                 stride=1, padding=0, relu=True)
    out = conv2d(out, bp["conv2"]["w"], bp["conv2"]["b"],
                 stride=bp["stride"], padding=1, relu=True)
    if "down" in bp:
        identity = conv2d(x, bp["down"]["w"], bp["down"]["b"],
                          stride=bp["stride"], padding=0, relu=False)
    else:
        identity = x
    # conv3 + bias + shortcut add + ReLU fused in one Pallas matmul epilogue.
    return conv2d(out, bp["conv3"]["w"], bp["conv3"]["b"],
                  stride=1, padding=0, relu=False, residual=identity)


def ssd_plus_forward(x_nchw, p, num_classes):
    x = jnp.transpose(x_nchw, (0, 2, 3, 1)).astype(jnp.float32)  # NCHW->NHWC
    features = []
    # backbone children 0-3: conv1 (+folded bn1 + relu), maxpool
    x = conv2d(x, p["conv1"]["w"], p["conv1"]["b"],
               stride=2, padding=3, relu=True)
    x = maxpool2d(x, 3, 2, 1)
    # backbone children 4-7: resnet layer1..layer4
    for li, layer in enumerate(p["layers"]):
        for bp in layer:
            x = bottleneck(x, bp)
        if li == 1:       # sequential child index 5 (layer2) -> L2Norm feature
            features.append(l2norm(x, p["l2norm_w"]))
        elif li == 2:     # sequential child index 6 (layer3)
            features.append(x)
    # backbone children 8-12
    x = maxpool2d(x, 3, 1, 1)
    x = conv2d(x, p["conv_dil"]["w"], p["conv_dil"]["b"],
               stride=1, padding=6, dilation=6, relu=True)
    x = conv2d(x, p["conv_1x1"]["w"], p["conv_1x1"]["b"],
               stride=1, padding=0, relu=True)
    # extra layers (relu applied to every one; every odd index is a feature)
    for i, ep in enumerate(p["extras"]):
        x = conv2d(x, ep["w"], ep["b"],
                   stride=ep["stride"], padding=ep["padding"], relu=True)
        if i % 2 == 1:
            features.append(x)
    # heads (NHWC output already matches torch's permute(0, 2, 3, 1)).
    # reg + cls heads on the same feature share one im2col/matmul: the weights
    # are concatenated along Cout, zero-padded to a multiple of 128 for
    # lane-dense output stores, and the result is split/trimmed by channel.
    nb = x_nchw.shape[0]
    locs, confs = [], []
    for f, rp, cp in zip(features, p["reg_heads"], p["cls_heads"]):
        n_reg = rp["w"].shape[-1]
        n_cls = cp["w"].shape[-1]
        n_tot = n_reg + n_cls
        n_pad = _rup(n_tot, 128)
        w_cat = jnp.concatenate([rp["w"], cp["w"]], axis=-1)
        b_cat = jnp.concatenate([rp["b"], cp["b"]], axis=0)
        if n_pad != n_tot:
            w_cat = jnp.pad(w_cat,
                            ((0, 0), (0, 0), (0, 0), (0, n_pad - n_tot)))
            b_cat = jnp.pad(b_cat, ((0, n_pad - n_tot),))
        out = conv2d(f, w_cat, b_cat, stride=1, padding=1)
        locs.append(out[..., :n_reg].reshape(nb, -1))
        confs.append(out[..., n_reg:n_tot].reshape(nb, -1))
    locations = jnp.concatenate(locs, axis=1).reshape(nb, -1, 4)
    confidences = jnp.concatenate(confs, axis=1).reshape(nb, -1, num_classes)
    return locations.astype(jnp.float32), confidences.astype(jnp.float32)


if __name__ == "__main__":
    num_classes = 3
    bboxes = (4, 6, 6, 6, 4, 4)
    params = build_params(num_classes, bboxes, seed=0)
    # 288x288 is the smallest "nice" spatial size the architecture supports
    # (the last two unpadded 3x3 extra convs need >= 9x9 at stride 32).
    x = jax.random.normal(jax.random.PRNGKey(0), (2, 3, 288, 288), jnp.float32)
    locations, confidences = ssd_plus_forward(x, params, num_classes)
    jax.block_until_ready((locations, confidences))
    assert locations.shape == (2, 7804, 4), locations.shape
    assert confidences.shape == (2, 7804, num_classes), confidences.shape
    assert bool(jnp.all(jnp.isfinite(locations)))
    assert bool(jnp.all(jnp.isfinite(confidences)))
    print("KERNEL_OK")
</pallas_src>

<mosaic_0001>
module attributes {stable_mosaic.version = 11 : i64} {
  func.func @_mm1_relu_kernel(%arg0: i32, %arg1: i32, %arg2: memref<256x147xbf16, #tpu.memory_space<vmem>>, %arg3: memref<147x64xbf16, #tpu.memory_space<vmem>>, %arg4: memref<1x64xf32, #tpu.memory_space<vmem>>, %arg5: memref<256x64xbf16, #tpu.memory_space<vmem>>) attributes {dimension_semantics = [#tpu.dimension_semantics<parallel>, #tpu.dimension_semantics<parallel>], iteration_bounds = array<i64: 162, 1>, scalar_prefetch = 0 : i64, scratch_operands = 0 : i64, tpu.core_type = #tpu.core_type<tc>, window_params = [{transform_indices = @transform_0, window_bounds = array<i64: 256, 147>}, {transform_indices = @transform_1, window_bounds = array<i64: 147, 64>}, {transform_indices = @transform_2, window_bounds = array<i64: 1, 64>}, {transform_indices = @transform_3, window_bounds = array<i64: 256, 64>}]} {
    %c0 = arith.constant 0 : index
    %c0_0 = arith.constant 0 : index
    %0 = vector.load %arg2[%c0, %c0_0] : memref<256x147xbf16, #tpu.memory_space<vmem>>, vector<256x147xbf16>
    %c0_1 = arith.constant 0 : index
    %c0_2 = arith.constant 0 : index
    %1 = vector.load %arg3[%c0_1, %c0_2] : memref<147x64xbf16, #tpu.memory_space<vmem>>, vector<147x64xbf16>
    %cst = arith.constant dense<0.000000e+00> : vector<256x64xf32>
    %2 = tpu.matmul %0, %1, %cst {dimension_numbers = #tpu.dot_dimension_numbers<[1], [0], [0], [1], [0, 0, 1, 1], [], []>} : vector<256x147xbf16>, vector<147x64xbf16>, vector<256x64xf32> -> vector<256x64xf32>
    %c0_3 = arith.constant 0 : index
    %c0_4 = arith.constant 0 : index
    %3 = vector.load %arg4[%c0_3, %c0_4] : memref<1x64xf32, #tpu.memory_space<vmem>>, vector<1x64xf32>
    %4 = vector.broadcast %3 : vector<1x64xf32> to vector<256x64xf32>
    %5 = arith.addf %2, %4 : vector<256x64xf32>
    %cst_5 = arith.constant 0.000000e+00 : f32
    %6 = vector.broadcast %cst_5 : f32 to vector<256x64xf32>
    %7 = arith.maximumf %5, %6 : vector<256x64xf32>
    %8 = arith.truncf %7 : vector<256x64xf32> to vector<256x64xbf16>
    %c0_6 = arith.constant 0 : index
    %c0_7 = arith.constant 0 : index
    %9 = vector.load %arg5[%c0_6, %c0_7] : memref<256x64xbf16, #tpu.memory_space<vmem>>, vector<256x64xbf16>
    tpu.vector_store %arg5[%c0_6, %c0_7], %8 {strides = array<i32>} : memref<256x64xbf16, #tpu.memory_space<vmem>>, vector<256x64xbf16>,
    return
  }
  func.func @transform_0(%arg0: i32, %arg1: i32) -> (i32, i32) {
    %c0_i32 = arith.constant 0 : i32
    %c0_i32_0 = arith.constant 0 : i32
    return %arg0, %c0_i32 : i32, i32
  }
  func.func @transform_1(%arg0: i32, %arg1: i32) -> (i32, i32) {
    %c0_i32 = arith.constant 0 : i32
    %c0_i32_0 = arith.constant 0 : i32
    return %c0_i32, %arg1 : i32, i32
  }
  func.func @transform_2(%arg0: i32, %arg1: i32) -> (i32, i32) {
    %c0_i32 = arith.constant 0 : i32
    %c0_i32_0 = arith.constant 0 : i32
    return %c0_i32, %arg1 : i32, i32
  }
  func.func @transform_3(%arg0: i32, %arg1: i32) -> (i32, i32) {
    %c0_i32 = arith.constant 0 : i32
    return %arg0, %arg1 : i32, i32
  }
}

</mosaic_0001>

<bundles_post_ra>
// kernel: conv2d.1
= control target key start
LH: loop header
LB: loop body
LE: loop exit
PB: predicated region body
PF: predicated region fallthrough
CT: control target
= control target key end

     0   :  { %s1288_s12 = smov 0   ;;  %s1290_s13 = smov 0   ;;  %s1508_s0 = inlined_call_operand.vmem [shape: bf16[41472,147], index: 0, kind: input, shape index: {}]   ;;  %s1509_s1 = inlined_call_operand.vmem [shape: bf16[147,64], index: 1, kind: input, shape index: {}]   ;;  %s1510_s2 = inlined_call_operand.vmem [shape: f32[1,64], index: 2, kind: input, shape index: {}]   ;;  %s1511_s3 = inlined_call_operand.vmem [shape: bf16[41472,64], index: 3, kind: output, shape index: {}]  }
   0x1   :  { %s1292_s14 = smov 0  }
   0x2 LB: > { %s25_s15 = sadd.s32 1, %s1260_s13  ;;  %p1006_p0 = scmp.ge.s32.totalorder %s1264_s14, 1  ;;  %s1264_s14 = sphi %s1292_s14, %s13_s14   ;;  %s1260_s13 = sphi %s1290_s13, %s1513_s13   ;;  %s1256_s12 = sphi %s1288_s12, %s1512_s12  }
   0x3   : > { %p27_p1 = scmp.ge.s32.totalorder %s25_s15, 162  ;;  %p170_p2 = scmp.lt.s32.totalorder %s1264_s14, 163 }
   0x5   : > { %s1515_s15 = smov (%p27_p1, %s25_s15), 0  ;;  %p171_p3 = pnand %p1006_p0, %p170_p2 }
   0x6   : > { %v1184_v0 = vld [vmem:[%s1509_s1] sm:$0xff] (!%p171_p3)   ;;  %v1266_v1 = vmov (!%p171_p3), 0   ;;  %v1185_v2 = vld [vmem:[%s1509_s1 + $0x8] sm:$0xff] (!%p171_p3)   ;;  %v1186_v3 = vld [vmem:[%s1509_s1 + $0x10] sm:$0xff] (!%p171_p3)   ;;  %s1007_s22 = sshll.u32 (!%p171_p3), %s1256_s12, 5  ;;  %vm488_vm0 = vcmask (!%p171_p3), 154624  }
   0x7   : > { %174 = sbr.rel (%p171_p3) target bundleno = 324 (0x144), region = 32  ;;  %544 = vmatprep.subr.bf16.mxu0 (!%p171_p3), %v1266_v1  ;;  %1138 = vmatprep.subr.bf16.mxu1 (!%p171_p3), %v1266_v1  ;;  %p206_p4 = scmp.lt.s32.totalorder (!%p171_p3), %s1007_s22, 5183  ;;  %v1187_v4 = vld [vmem:[%s1509_s1 + $0x18] sm:$0xff] (!%p171_p3)   ;;  %v1188_v5 = vld [vmem:[%s1509_s1 + $0x20] sm:$0xff] (!%p171_p3)   ;;  %v1189_v8 = vld [vmem:[%s1509_s1 + $0x28] sm:$0xff] (!%p171_p3)   ;;  %vm537_vm1 = vcmask (!%p171_p3), 1040384  }
   0x8   : > { %545 = vmatpush1.bf16.msra.mxu0 (!%p171_p3), %v1184_v0  ;;  %1148 = vmatpush1.bf16.msra.mxu1 (!%p171_p3), %v1184_v0  ;;  %v1190_v9 = vld [vmem:[%s1509_s1 + $0x30] sm:$0xff] (!%p171_p3)   ;;  %v1191_v10 = vld [vmem:[%s1509_s1 + $0x38] sm:$0xff] (!%p171_p3)   ;;  %vm538_vm2 = vcmask (!%p171_p3), 1041408   ;;  %v1267_v11 = vmov (!%p171_p3), 65535   ;;  %v1192_v13 = vld [vmem:[%s1509_s1 + $0x40] sm:$0xff] (!%p171_p3)   ;;  %vm865_vm3 = vcmask (!%p171_p3), 519168  }
   0x9   : > { %546 = vmatprep.subr.bf16.mxu0 (!%p171_p3), %v1266_v1  ;;  %1139 = vmatprep.subr.bf16.mxu1 (!%p171_p3), %v1266_v1  ;;  %v539_v12 = vsel (!%p171_p3), %vm537_vm1, 4294967295, %v1267_v11  ;;  %v1193_v14 = vld [vmem:[%s1509_s1 + $0x48] ss:$0 sps:$4 sm:$0x33] (!%p171_p3)   ;;  %v1395_v47 = vld [vmem:[%s1510_s2] ss:$0 sm:$0xff] (!%p171_p3) }
   0xa   : > { %v540_v15 = vsel (!%p171_p3), %vm538_vm2, %v539_v12, 0 }
   0xb   : > { %v542_v16 = vand.u32 (!%p171_p3), %v1193_v14, %v540_v15 }
   0xc   : > { %547 = vmatpush1.bf16.msra.mxu0 (!%p171_p3), %v1185_v2  ;;  %1149 = vmatpush1.bf16.msra.mxu1 (!%p171_p3), %v1185_v2 }
   0xd   : > { %548 = vmatprep.subr.bf16.mxu0 (!%p171_p3), %v1266_v1  ;;  %1140 = vmatprep.subr.bf16.mxu1 (!%p171_p3), %v1266_v1 }
   0xe   : > { %s1517_s22 = smov (!%p206_p4, %s1007_s22), 5183 }
   0xf   : > { %s1105_s25 = sshll.u32 %s1517_s22, 3  ;;  %s1011_s19 = sshll.u32 %s1517_s22, 2 }
  0x10   : > { %549 = vmatpush1.bf16.msra.mxu0 %v1186_v3  ;;  %1150 = vmatpush1.bf16.msra.mxu1 %v1186_v3  ;;  %s1324_s28 = scalar_lea.vmem %s1508_s0, %s1105_s25  ;;  %s1405_s22 = scalar_lea.vmem %s1511_s3, %s1011_s19 }
  0x11   : > { %550 = vmatprep.subr.bf16.mxu0 %v1266_v1  ;;  %1141 = vmatprep.subr.bf16.mxu1 %v1266_v1  ;;  %v1196_v6 = vld [vmem:[%s1324_s28 + $0x4] ss:$8 sps:$4 sm:$0xff]   ;;  %v1194_v17 = vld [vmem:[%s1324_s28] ss:$8 sps:$4 sm:$0xff]   ;;  %v1200_v19 = vld [vmem:[%s1324_s28 + $0x14] ss:$8 sps:$4 sm:$0xff]  }
  0x12   : > { %v1199_v7 = vld [vmem:[%s1324_s28 + $0x84] ss:$8 sps:$4 sm:$0xff]   ;;  %1055 = vmatprep.mubr.msk.bf16.mxu0 %vm488_vm0, %v1196_v6  ;;  %v1197_v18 = vld [vmem:[%s1324_s28 + $0x80] ss:$8 sps:$4 sm:$0xff]   ;;  %v1202_v20 = vld [vmem:[%s1324_s28 + $0x94] ss:$8 sps:$4 sm:$0xff]  }
  0x13   : > { %1063 = vmatprep.mubr.msk.bf16.mxu1 %vm488_vm0, %v1199_v7  ;;  %v1204_v21 = vld [vmem:[%s1324_s28 + $0x10] ss:$8 sps:$4 sm:$0xff]   ;;  %v1206_v23 = vld [vmem:[%s1324_s28 + $0x24] ss:$8 sps:$4 sm:$0xff]   ;;  %v1210_v25 = vld [vmem:[%s1324_s28 + $0x20] ss:$8 sps:$4 sm:$0xff]  }
  0x14   : > { %551 = vmatpush1.bf16.msra.mxu0 %v1187_v4  ;;  %1151 = vmatpush1.bf16.msra.mxu1 %v1187_v4  ;;  %v1205_v22 = vld [vmem:[%s1324_s28 + $0x90] ss:$8 sps:$4 sm:$0xff]   ;;  %v1208_v24 = vld [vmem:[%s1324_s28 + $0xa4] ss:$8 sps:$4 sm:$0xff]   ;;  %v1211_v26 = vld [vmem:[%s1324_s28 + $0xa0] ss:$8 sps:$4 sm:$0xff]  }
  0x15   : > { %552 = vmatprep.subr.bf16.mxu0 %v1266_v1  ;;  %1142 = vmatprep.subr.bf16.mxu1 %v1266_v1  ;;  %v1212_v27 = vld [vmem:[%s1324_s28 + $0x34] ss:$8 sps:$4 sm:$0xff]   ;;  %v1216_v29 = vld [vmem:[%s1324_s28 + $0x30] ss:$8 sps:$4 sm:$0xff]   ;;  %v1218_v31 = vld [vmem:[%s1324_s28 + $0x44] ss:$8 sps:$4 sm:$0xff]  }
  0x16   : > { %v1214_v28 = vld [vmem:[%s1324_s28 + $0xb4] ss:$8 sps:$4 sm:$0xff]   ;;  %v1217_v30 = vld [vmem:[%s1324_s28 + $0xb0] ss:$8 sps:$4 sm:$0xff]   ;;  %v1220_v32 = vld [vmem:[%s1324_s28 + $0xc4] ss:$8 sps:$4 sm:$0xff]  }
  0x17   : > { %v1222_v33 = vld [vmem:[%s1324_s28 + $0x40] ss:$8 sps:$4 sm:$0xff]   ;;  %v1224_v35 = vld [vmem:[%s1324_s28 + $0x54] ss:$8 sps:$4 sm:$0xff]   ;;  %v1228_v37 = vld [vmem:[%s1324_s28 + $0x50] ss:$8 sps:$4 sm:$0xff]  }
  0x18   : > { %553 = vmatpush1.bf16.msra.mxu0 %v1188_v5  ;;  %1152 = vmatpush1.bf16.msra.mxu1 %v1188_v5  ;;  %v1223_v34 = vld [vmem:[%s1324_s28 + $0xc0] ss:$8 sps:$4 sm:$0xff]   ;;  %v1226_v36 = vld [vmem:[%s1324_s28 + $0xd4] ss:$8 sps:$4 sm:$0xff]   ;;  %v1229_v38 = vld [vmem:[%s1324_s28 + $0xd0] ss:$8 sps:$4 sm:$0xff]  }
  0x19   : > { %554 = vmatprep.subr.bf16.mxu0 %v1266_v1  ;;  %1143 = vmatprep.subr.bf16.mxu1 %v1266_v1  ;;  %v1230_v39 = vld [vmem:[%s1324_s28 + $0x64] ss:$8 sps:$4 sm:$0xff]   ;;  %v1234_v41 = vld [vmem:[%s1324_s28 + $0x60] ss:$8 sps:$4 sm:$0xff]   ;;  %v1236_v43 = vld [vmem:[%s1324_s28 + $0x74] ss:$8 sps:$4 sm:$0xff]  }
  0x1a   : > { %v1232_v40 = vld [vmem:[%s1324_s28 + $0xe4] ss:$8 sps:$4 sm:$0xff]   ;;  %v1235_v42 = vld [vmem:[%s1324_s28 + $0xe0] ss:$8 sps:$4 sm:$0xff]   ;;  %v1238_v44 = vld [vmem:[%s1324_s28 + $0xf4] ss:$8 sps:$4 sm:$0xff]  }
  0x1b   : > { %v1240_v45 = vld [vmem:[%s1324_s28 + $0x70] ss:$8 sps:$4 sm:$0xff]  }
  0x1c   : > { %555 = vmatpush1.bf16.msra.mxu0 %v1189_v8  ;;  %1153 = vmatpush1.bf16.msra.mxu1 %v1189_v8  ;;  %v1241_v46 = vld [vmem:[%s1324_s28 + $0xf0] ss:$8 sps:$4 sm:$0xff]  }
  0x1d   : > { %556 = vmatprep.subr.bf16.mxu0 %v1266_v1  ;;  %1144 = vmatprep.subr.bf16.mxu1 %v1266_v1 }
  0x20   : > { %557 = vmatpush1.bf16.msra.mxu0 %v1190_v9  ;;  %1154 = vmatpush1.bf16.msra.mxu1 %v1190_v9 }
  0x21   : > { %558 = vmatprep.subr.bf16.mxu0 %v1266_v1  ;;  %1145 = vmatprep.subr.bf16.mxu1 %v1266_v1 }
  0x24   : > { %559 = vmatpush1.bf16.msra.mxu0 %v1191_v10  ;;  %1155 = vmatpush1.bf16.msra.mxu1 %v1191_v10 }
  0x25   : > { %560 = vmatprep.subr.bf16.mxu0 %v1266_v1  ;;  %1146 = vmatprep.subr.bf16.mxu1 %v1266_v1 }
  0x28   : > { %561 = vmatpush1.bf16.msra.mxu0 %v1192_v13  ;;  %1156 = vmatpush1.bf16.msra.mxu1 %v1192_v13 }
  0x29   : > { %562 = vmatprep.subr.bf16.mxu0 %v1266_v1  ;;  %1147 = vmatprep.subr.bf16.mxu1 %v1266_v1 }
  0x2c   : > { %563 = vmatpush1.bf16.msra.mxu0 %v542_v16  ;;  %1157 = vmatpush1.bf16.msra.mxu1 %v542_v16 }
  0x2f   : > { %577 = vmatmul.mubr.bf16.vlgmr.msra.gmra.mrb[0].mxu0 %v1194_v17  ;;  %641 = vmatmul.mubr.bf16.vlgmr.msra.gmra.mrb[0].mxu1 %v1197_v18 }
  0x30   : > { %1056 = vmatprep.mubr.msk.bf16.mxu0 %vm488_vm0, %v1200_v19  ;;  %1064 = vmatprep.mubr.msk.bf16.mxu1 %vm488_vm0, %v1202_v20 }
  0x37   : > { %585 = vmatmul.mubr.bf16.gmra.mrb[4].mxu0 %v1204_v21  ;;  %649 = vmatmul.mubr.bf16.gmra.mrb[4].mxu1 %v1205_v22 }
  0x38   : > { %1057 = vmatprep.mubr.msk.bf16.mxu0 %vm488_vm0, %v1206_v23  ;;  %1065 = vmatprep.mubr.msk.bf16.mxu1 %vm488_vm0, %v1208_v24 }
  0x3f   : > { %593 = vmatmul.mubr.bf16.gmra.mrb[8].mxu0 %v1210_v25  ;;  %657 = vmatmul.mubr.bf16.gmra.mrb[8].mxu1 %v1211_v26 }
  0x40   : > { %1058 = vmatprep.mubr.msk.bf16.mxu0 %vm488_vm0, %v1212_v27  ;;  %1066 = vmatprep.mubr.msk.bf16.mxu1 %vm488_vm0, %v1214_v28 }
  0x47   : > { %601 = vmatmul.mubr.bf16.gmra.mrb[12].mxu0 %v1216_v29  ;;  %665 = vmatmul.mubr.bf16.gmra.mrb[12].mxu1 %v1217_v30 }
  0x48   : > { %1059 = vmatprep.mubr.msk.bf16.mxu0 %vm488_vm0, %v1218_v31  ;;  %1067 = vmatprep.mubr.msk.bf16.mxu1 %vm488_vm0, %v1220_v32 }
  0x4f   : > { %609 = vmatmul.mubr.bf16.gmra.mrb[16].mxu0 %v1222_v33  ;;  %673 = vmatmul.mubr.bf16.gmra.mrb[16].mxu1 %v1223_v34 }
  0x50   : > { %1060 = vmatprep.mubr.msk.bf16.mxu0 %vm488_vm0, %v1224_v35  ;;  %1068 = vmatprep.mubr.msk.bf16.mxu1 %vm488_vm0, %v1226_v36 }
  0x57   : > { %617 = vmatmul.mubr.bf16.gmra.mrb[20].mxu0 %v1228_v37  ;;  %681 = vmatmul.mubr.bf16.gmra.mrb[20].mxu1 %v1229_v38 }
  0x58   : > { %1061 = vmatprep.mubr.msk.bf16.mxu0 %vm488_vm0, %v1230_v39  ;;  %1069 = vmatprep.mubr.msk.bf16.mxu1 %vm488_vm0, %v1232_v40 }
  0x5f   : > { %625 = vmatmul.mubr.bf16.gmra.mrb[24].mxu0 %v1234_v41  ;;  %689 = vmatmul.mubr.bf16.gmra.mrb[24].mxu1 %v1235_v42 }
  0x60   : > { %1062 = vmatprep.mubr.msk.bf16.mxu0 %vm488_vm0, %v1236_v43  ;;  %1070 = vmatprep.mubr.msk.bf16.mxu1 %vm488_vm0, %v1238_v44 }
  0x67   : > { %633 = vmatmul.mubr.bf16.gmra.mrb[28].mxu0 %v1240_v45  ;;  %697 = vmatmul.mubr.bf16.gmra.mrb[28].mxu1 %v1241_v46 }
 0x102   : > { %v578_v48 = vpop.f32.mrb[0].mxu0  ;;  %v642_v49 = vpop.f32.mrb[0].mxu1 }
 0x103   : > { %v579_v50 = vadd.f32 %v1395_v47, %v578_v48  ;;  %v643_v51 = vadd.f32 %v1395_v47, %v642_v49  ;;  %v580_v52 = vpop.f32.mrb[1].mxu0  ;;  %v644_v53 = vpop.f32.mrb[1].mxu1 }
 0x104   : > { %v581_v54 = vpop.f32.mrb[2].mxu0  ;;  %v645_v55 = vpop.f32.mrb[2].mxu1 }
 0x105   : > { %v705_v56 = vmax.f32 %v579_v50, 0.0  ;;  %v721_v57 = vmax.f32 %v643_v51, 0.0  ;;  %v582_v58 = vadd.f32 %v1395_v47, %v581_v54  ;;  %v646_v59 = vadd.f32 %v1395_v47, %v645_v55  ;;  %v583_v60 = vpop.f32.mrb[3].mxu0  ;;  %v647_v61 = vpop.f32.mrb[3].mxu1 }
 0x107   : > { %v1106_v62 = vpack.c.bf16 %v705_v56, %v705_v56  ;;  %v1122_v63 = vpack.c.bf16 %v721_v57, %v721_v57  ;;  %v706_v0 = vmax.f32 %v582_v58, 0.0  ;;  %v722_v1 = vmax.f32 %v646_v59, 0.0 }
 0x109   : > { %866 = vst.msk [vmem:[%s1405_s22] sm:$0xf] %vm865_vm3, %v1106_v62  ;;  %882 = vst.msk [vmem:[%s1405_s22 + $0x40] sm:$0xf] %vm865_vm3, %v1122_v63  ;;  %v1107_v2 = vpack.c.bf16 %v706_v0, %v706_v0  ;;  %v1123_v3 = vpack.c.bf16 %v722_v1, %v722_v1 }
 0x10a   : > { %v586_v4 = vpop.f32.mrb[4].mxu0  ;;  %v650_v5 = vpop.f32.mrb[4].mxu1 }
 0x10b   : > { %867 = vst.msk [vmem:[%s1405_s22 + $0x4] sm:$0xf] %vm865_vm3, %v1107_v2  ;;  %883 = vst.msk [vmem:[%s1405_s22 + $0x44] sm:$0xf] %vm865_vm3, %v1123_v3  ;;  %v587_v6 = vadd.f32 %v1395_v47, %v586_v4  ;;  %v651_v7 = vadd.f32 %v1395_v47, %v650_v5  ;;  %v588_v8 = vpop.f32.mrb[5].mxu0  ;;  %v652_v9 = vpop.f32.mrb[5].mxu1 }
 0x10c   : > { %v589_v10 = vpop.f32.mrb[6].mxu0  ;;  %v653_v11 = vpop.f32.mrb[6].mxu1 }
 0x10d   : > { %v707_v12 = vmax.f32 %v587_v6, 0.0  ;;  %v723_v13 = vmax.f32 %v651_v7, 0.0  ;;  %v590_v14 = vadd.f32 %v1395_v47, %v589_v10  ;;  %v654_v15 = vadd.f32 %v1395_v47, %v653_v11  ;;  %v591_v16 = vpop.f32.mrb[7].mxu0  ;;  %v655_v17 = vpop.f32.mrb[7].mxu1 }
 0x10f   : > { %v1108_v18 = vpack.c.bf16 %v707_v12, %v707_v12  ;;  %v1124_v19 = vpack.c.bf16 %v723_v13, %v723_v13  ;;  %v708_v20 = vmax.f32 %v590_v14, 0.0  ;;  %v724_v21 = vmax.f32 %v654_v15, 0.0 }
 0x111   : > { %868 = vst.msk [vmem:[%s1405_s22 + $0x8] sm:$0xf] %vm865_vm3, %v1108_v18  ;;  %884 = vst.msk [vmem:[%s1405_s22 + $0x48] sm:$0xf] %vm865_vm3, %v1124_v19  ;;  %v1109_v22 = vpack.c.bf16 %v708_v20, %v708_v20  ;;  %v1125_v23 = vpack.c.bf16 %v724_v21, %v724_v21 }
 0x112   : > { %v594_v24 = vpop.f32.mrb[8].mxu0  ;;  %v658_v25 = vpop.f32.mrb[8].mxu1 }
 0x113   : > { %869 = vst.msk [vmem:[%s1405_s22 + $0xc] sm:$0xf] %vm865_vm3, %v1109_v22  ;;  %885 = vst.msk [vmem:[%s1405_s22 + $0x4c] sm:$0xf] %vm865_vm3, %v1125_v23  ;;  %v595_v26 = vadd.f32 %v1395_v47, %v594_v24  ;;  %v659_v27 = vadd.f32 %v1395_v47, %v658_v25  ;;  %v596_v28 = vpop.f32.mrb[9].mxu0  ;;  %v660_v29 = vpop.f32.mrb[9].mxu1 }
 0x114   : > { %v597_v30 = vpop.f32.mrb[10].mxu0  ;;  %v661_v31 = vpop.f32.mrb[10].mxu1 }
 0x115   : > { %v709_v32 = vmax.f32 %v595_v26, 0.0  ;;  %v725_v33 = vmax.f32 %v659_v27, 0.0  ;;  %v598_v34 = vadd.f32 %v1395_v47, %v597_v30  ;;  %v662_v35 = vadd.f32 %v1395_v47, %v661_v31  ;;  %v599_v36 = vpop.f32.mrb[11].mxu0  ;;  %v663_v37 = vpop.f32.mrb[11].mxu1 }
 0x117   : > { %v1110_v38 = vpack.c.bf16 %v709_v32, %v709_v32  ;;  %v1126_v39 = vpack.c.bf16 %v725_v33, %v725_v33  ;;  %v710_v40 = vmax.f32 %v598_v34, 0.0  ;;  %v726_v41 = vmax.f32 %v662_v35, 0.0 }
 0x119   : > { %870 = vst.msk [vmem:[%s1405_s22 + $0x10] sm:$0xf] %vm865_vm3, %v1110_v38  ;;  %886 = vst.msk [vmem:[%s1405_s22 + $0x50] sm:$0xf] %vm865_vm3, %v1126_v39  ;;  %v1111_v42 = vpack.c.bf16 %v710_v40, %v710_v40  ;;  %v1127_v43 = vpack.c.bf16 %v726_v41, %v726_v41 }
 0x11a   : > { %v602_v44 = vpop.f32.mrb[12].mxu0  ;;  %v666_v45 = vpop.f32.mrb[12].mxu1 }
 0x11b   : > { %871 = vst.msk [vmem:[%s1405_s22 + $0x14] sm:$0xf] %vm865_vm3, %v1111_v42  ;;  %887 = vst.msk [vmem:[%s1405_s22 + $0x54] sm:$0xf] %vm865_vm3, %v1127_v43  ;;  %v603_v46 = vadd.f32 %v1395_v47, %v602_v44  ;;  %v667_v48 = vadd.f32 %v1395_v47, %v666_v45  ;;  %v604_v49 = vpop.f32.mrb[13].mxu0  ;;  %v668_v50 = vpop.f32.mrb[13].mxu1 }
 0x11c   : > { %v605_v51 = vpop.f32.mrb[14].mxu0  ;;  %v669_v52 = vpop.f32.mrb[14].mxu1 }
 0x11d   : > { %v711_v53 = vmax.f32 %v603_v46, 0.0  ;;  %v727_v54 = vmax.f32 %v667_v48, 0.0  ;;  %v606_v55 = vadd.f32 %v1395_v47, %v605_v51  ;;  %v670_v56 = vadd.f32 %v1395_v47, %v669_v52  ;;  %v607_v57 = vpop.f32.mrb[15].mxu0  ;;  %v671_v58 = vpop.f32.mrb[15].mxu1 }
 0x11f   : > { %v1112_v59 = vpack.c.bf16 %v711_v53, %v711_v53  ;;  %v1128_v60 = vpack.c.bf16 %v727_v54, %v727_v54  ;;  %v712_v61 = vmax.f32 %v606_v55, 0.0  ;;  %v728_v62 = vmax.f32 %v670_v56, 0.0 }
 0x121   : > { %872 = vst.msk [vmem:[%s1405_s22 + $0x18] sm:$0xf] %vm865_vm3, %v1112_v59  ;;  %888 = vst.msk [vmem:[%s1405_s22 + $0x58] sm:$0xf] %vm865_vm3, %v1128_v60  ;;  %v1113_v63 = vpack.c.bf16 %v712_v61, %v712_v61  ;;  %v1129_v0 = vpack.c.bf16 %v728_v62, %v728_v62 }
 0x122   : > { %v610_v1 = vpop.f32.mrb[16].mxu0  ;;  %v674_v2 = vpop.f32.mrb[16].mxu1 }
 0x123   : > { %873 = vst.msk [vmem:[%s1405_s22 + $0x1c] sm:$0xf] %vm865_vm3, %v1113_v63  ;;  %889 = vst.msk [vmem:[%s1405_s22 + $0x5c] sm:$0xf] %vm865_vm3, %v1129_v0  ;;  %v611_v3 = vadd.f32 %v1395_v47, %v610_v1  ;;  %v675_v4 = vadd.f32 %v1395_v47, %v674_v2  ;;  %v612_v5 = vpop.f32.mrb[17].mxu0  ;;  %v676_v6 = vpop.f32.mrb[17].mxu1 }
 0x124   : > { %v613_v7 = vpop.f32.mrb[18].mxu0  ;;  %v677_v8 = vpop.f32.mrb[18].mxu1 }
 0x125   : > { %v713_v9 = vmax.f32 %v611_v3, 0.0  ;;  %v729_v10 = vmax.f32 %v675_v4, 0.0  ;;  %v614_v11 = vadd.f32 %v1395_v47, %v613_v7  ;;  %v678_v12 = vadd.f32 %v1395_v47, %v677_v8  ;;  %v615_v13 = vpop.f32.mrb[19].mxu0  ;;  %v679_v14 = vpop.f32.mrb[19].mxu1 }
 0x127   : > { %v1114_v15 = vpack.c.bf16 %v713_v9, %v713_v9  ;;  %v1130_v16 = vpack.c.bf16 %v729_v10, %v729_v10  ;;  %v714_v17 = vmax.f32 %v614_v11, 0.0  ;;  %v730_v18 = vmax.f32 %v678_v12, 0.0 }
 0x129   : > { %874 = vst.msk [vmem:[%s1405_s22 + $0x20] sm:$0xf] %vm865_vm3, %v1114_v15  ;;  %890 = vst.msk [vmem:[%s1405_s22 + $0x60] sm:$0xf] %vm865_vm3, %v1130_v16  ;;  %v1115_v19 = vpack.c.bf16 %v714_v17, %v714_v17  ;;  %v1131_v20 = vpack.c.bf16 %v730_v18, %v730_v18 }
 0x12a   : > { %v618_v21 = vpop.f32.mrb[20].mxu0  ;;  %v682_v22 = vpop.f32.mrb[20].mxu1 }
 0x12b   : > { %875 = vst.msk [vmem:[%s1405_s22 + $0x24] sm:$0xf] %vm865_vm3, %v1115_v19  ;;  %891 = vst.msk [vmem:[%s1405_s22 + $0x64] sm:$0xf] %vm865_vm3, %v1131_v20  ;;  %v619_v23 = vadd.f32 %v1395_v47, %v618_v21  ;;  %v683_v24 = vadd.f32 %v1395_v47, %v682_v22  ;;  %v620_v25 = vpop.f32.mrb[21].mxu0  ;;  %v684_v26 = vpop.f32.mrb[21].mxu1 }
 0x12c   : > { %v621_v27 = vpop.f32.mrb[22].mxu0  ;;  %v685_v28 = vpop.f32.mrb[22].mxu1 }
 0x12d   : > { %v715_v29 = vmax.f32 %v619_v23, 0.0  ;;  %v731_v30 = vmax.f32 %v683_v24, 0.0  ;;  %v622_v31 = vadd.f32 %v1395_v47, %v621_v27  ;;  %v686_v32 = vadd.f32 %v1395_v47, %v685_v28  ;;  %v623_v33 = vpop.f32.mrb[23].mxu0  ;;  %v687_v34 = vpop.f32.mrb[23].mxu1 }
 0x12f   : > { %v1116_v35 = vpack.c.bf16 %v715_v29, %v715_v29  ;;  %v1132_v36 = vpack.c.bf16 %v731_v30, %v731_v30  ;;  %v716_v37 = vmax.f32 %v622_v31, 0.0  ;;  %v732_v38 = vmax.f32 %v686_v32, 0.0 }
 0x131   : > { %876 = vst.msk [vmem:[%s1405_s22 + $0x28] sm:$0xf] %vm865_vm3, %v1116_v35  ;;  %892 = vst.msk [vmem:[%s1405_s22 + $0x68] sm:$0xf] %vm865_vm3, %v1132_v36  ;;  %v1117_v39 = vpack.c.bf16 %v716_v37, %v716_v37  ;;  %v1133_v40 = vpack.c.bf16 %v732_v38, %v732_v38 }
 0x132   : > { %v626_v41 = vpop.f32.mrb[24].mxu0  ;;  %v690_v42 = vpop.f32.mrb[24].mxu1 }
 0x133   : > { %877 = vst.msk [vmem:[%s1405_s22 + $0x2c] sm:$0xf] %vm865_vm3, %v1117_v39  ;;  %893 = vst.msk [vmem:[%s1405_s22 + $0x6c] sm:$0xf] %vm865_vm3, %v1133_v40  ;;  %v627_v43 = vadd.f32 %v1395_v47, %v626_v41  ;;  %v691_v44 = vadd.f32 %v1395_v47, %v690_v42  ;;  %v628_v45 = vpop.f32.mrb[25].mxu0  ;;  %v692_v46 = vpop.f32.mrb[25].mxu1 }
 0x134   : > { %v629_v48 = vpop.f32.mrb[26].mxu0  ;;  %v693_v49 = vpop.f32.mrb[26].mxu1 }
 0x135   : > { %v717_v50 = vmax.f32 %v627_v43, 0.0  ;;  %v733_v51 = vmax.f32 %v691_v44, 0.0  ;;  %v630_v52 = vadd.f32 %v1395_v47, %v629_v48  ;;  %v694_v53 = vadd.f32 %v1395_v47, %v693_v49  ;;  %v631_v54 = vpop.f32.mrb[27].mxu0  ;;  %v695_v55 = vpop.f32.mrb[27].mxu1 }
 0x137   : > { %v1118_v56 = vpack.c.bf16 %v717_v50, %v717_v50  ;;  %v1134_v57 = vpack.c.bf16 %v733_v51, %v733_v51  ;;  %v718_v58 = vmax.f32 %v630_v52, 0.0  ;;  %v734_v59 = vmax.f32 %v694_v53, 0.0 }
 0x139   : > { %878 = vst.msk [vmem:[%s1405_s22 + $0x30] sm:$0xf] %vm865_vm3, %v1118_v56  ;;  %894 = vst.msk [vmem:[%s1405_s22 + $0x70] sm:$0xf] %vm865_vm3, %v1134_v57  ;;  %v1119_v60 = vpack.c.bf16 %v718_v58, %v718_v58  ;;  %v1135_v61 = vpack.c.bf16 %v734_v59, %v734_v59 }
 0x13a   : > { %v634_v62 = vpop.f32.mrb[28].mxu0  ;;  %v698_v63 = vpop.f32.mrb[28].mxu1 }
 0x13b   : > { %879 = vst.msk [vmem:[%s1405_s22 + $0x34] sm:$0xf] %vm865_vm3, %v1119_v60  ;;  %895 = vst.msk [vmem:[%s1405_s22 + $0x74] sm:$0xf] %vm865_vm3, %v1135_v61  ;;  %v635_v0 = vadd.f32 %v1395_v47, %v634_v62  ;;  %v699_v1 = vadd.f32 %v1395_v47, %v698_v63  ;;  %v636_v2 = vpop.f32.mrb[29].mxu0  ;;  %v700_v3 = vpop.f32.mrb[29].mxu1 }
 0x13c   : > { %v637_v4 = vpop.f32.mrb[30].mxu0  ;;  %v701_v5 = vpop.f32.mrb[30].mxu1 }
 0x13d   : > { %v719_v6 = vmax.f32 %v635_v0, 0.0  ;;  %v735_v7 = vmax.f32 %v699_v1, 0.0  ;;  %v638_v8 = vadd.f32 %v1395_v47, %v637_v4  ;;  %v702_v9 = vadd.f32 %v1395_v47, %v701_v5  ;;  %v639_v10 = vpop.f32.mrb[31].mxu0  ;;  %v703_v11 = vpop.f32.mrb[31].mxu1 }
 0x13f   : > { %v1120_v12 = vpack.c.bf16 %v719_v6, %v719_v6  ;;  %v1136_v13 = vpack.c.bf16 %v735_v7, %v735_v7  ;;  %v720_v14 = vmax.f32 %v638_v8, 0.0  ;;  %v736_v15 = vmax.f32 %v702_v9, 0.0 }
 0x141   : > { %880 = vst.msk [vmem:[%s1405_s22 + $0x38] sm:$0xf] %vm865_vm3, %v1120_v12  ;;  %896 = vst.msk [vmem:[%s1405_s22 + $0x78] sm:$0xf] %vm865_vm3, %v1136_v13  ;;  %v1121_v16 = vpack.c.bf16 %v720_v14, %v720_v14  ;;  %v1137_v17 = vpack.c.bf16 %v736_v15, %v736_v15 }
 0x143   : > { %881 = vst.msk [vmem:[%s1405_s22 + $0x3c] sm:$0xf] %vm865_vm3, %v1121_v16  ;;  %897 = vst.msk [vmem:[%s1405_s22 + $0x7c] sm:$0xf] %vm865_vm3, %v1137_v17 }
 0x144 PF: > { %s13_s14 = sadd.s32 1, %s1264_s14   ;;  %s1512_s12 = smov %s1260_s13 }
 0x145   : > { %p10_p5 = scmp.ge.s32.totalorder %s13_s14, 164   ;;  %s1513_s13 = smov %s1515_s15 }
 0x147   :  { %12 = sbr.rel (!%p10_p5) target bundleno = 2 (0x2), region = 68 }

</bundles_post_ra>
